<compile_context>
chip_gen: v7x
topology: tpu7x:2x2x1
jax: 0.10.0
libtpu: 0.0.40
codegen_flags: <defaults>
</compile_context>

<pallas_src>
import functools

import numpy as np
import jax
import jax.numpy as jnp
from jax.experimental import pallas as pl
from jax.experimental.pallas import tpu as pltpu


def _round_up(x, m):
    return (x + m - 1) // m * m


# ----------------------------------------------------------------------------
# Pallas kernel: fused (im2col) matmul + bias + LeakyReLU
# ----------------------------------------------------------------------------
def _matmul_bias_act_kernel(x_ref, w_ref, b_ref, o_ref, *, lrelu, alpha):
    # x_ref: (TM, K) bf16, w_ref: (K, Cout_pad) bf16, b_ref: (1, Cout_pad) f32
    acc = jnp.dot(x_ref[...], w_ref[...], preferred_element_type=jnp.float32)
    acc = acc + b_ref[...]                       # (1, Cout_pad) broadcasts over rows
    if lrelu:
        acc = jnp.where(acc >= 0.0, acc, alpha * acc)
    o_ref[...] = acc.astype(o_ref.dtype)


def conv4x4_pallas(x_nhwc, w_kc, bias_pad, cout, *, stride, lrelu, alpha=0.2,
                   out_dtype=jnp.bfloat16):
    """4x4 conv, padding=1, stride in {1,2}, fused bias + optional LeakyReLU.

    x_nhwc   : (N, H, W, Cin) bf16 activations.
    w_kc     : (16*Cin, Cout_pad) bf16 weight, flattened (kh, kw, cin) on the
               contraction axis and zero-padded on Cout to a multiple of 128.
    bias_pad : (1, Cout_pad) f32.
    cout     : real (unpadded) number of output channels.
    """
    n, h, w, cin = x_nhwc.shape
    k, cout_pad = w_kc.shape
    assert k == 16 * cin
    ho = (h + 2 - 4) // stride + 1
    wo = (w + 2 - 4) // stride + 1

    # --- im2col glue (XLA): fold all 16 taps into the contraction axis -------
    xp = jnp.pad(x_nhwc, ((0, 0), (1, 1), (1, 1), (0, 0)))
    cols = []
    for kh in range(4):
        for kw in range(4):
            cols.append(xp[:, kh:kh + stride * (ho - 1) + 1:stride,
                           kw:kw + stride * (wo - 1) + 1:stride, :])
    patches = jnp.concatenate(cols, axis=-1).reshape(n * ho * wo, k)

    m = n * ho * wo
    tm = min(256, _round_up(m, 8))               # rows per grid step (sublane-dense)
    m_pad = _round_up(m, tm)
    if m_pad != m:
        patches = jnp.pad(patches, ((0, m_pad - m), (0, 0)))

    kernel = functools.partial(_matmul_bias_act_kernel, lrelu=lrelu, alpha=alpha)
    out = pl.pallas_call(
        kernel,
        out_shape=jax.ShapeDtypeStruct((m_pad, cout_pad), out_dtype),
        grid_spec=pltpu.PrefetchScalarGridSpec(
            num_scalar_prefetch=0,
            grid=(m_pad // tm,),
            in_specs=[
                pl.BlockSpec((tm, k), lambda i: (i, 0)),
                pl.BlockSpec((k, cout_pad), lambda i: (0, 0)),
                pl.BlockSpec((1, cout_pad), lambda i: (0, 0)),
            ],
            out_specs=pl.BlockSpec((tm, cout_pad), lambda i: (i, 0)),
        ),
        compiler_params=pltpu.CompilerParams(
            dimension_semantics=("parallel",),
            vmem_limit_bytes=48 << 20),          # safe under v7x 64 MiB physical VMEM
    )(patches, w_kc, bias_pad)

    return out[:m, :cout].reshape(n, ho, wo, cout)


# ----------------------------------------------------------------------------
# Parameters (deterministic, synthetic) + spectral norm (glue)
# ----------------------------------------------------------------------------
def spectral_normalize(w_oihw, u_key, n_power_iterations=1, eps=1e-12):
    """One power-iteration spectral norm, like torch.nn.utils.spectral_norm
    on the first (training) forward, with a deterministic u init."""
    cout = w_oihw.shape[0]
    w_mat = w_oihw.reshape(cout, -1)
    u = jax.random.normal(u_key, (cout,), dtype=jnp.float32)
    u = u / (jnp.linalg.norm(u) + eps)
    v = None
    for _ in range(n_power_iterations):
        v = w_mat.T @ u
        v = v / (jnp.linalg.norm(v) + eps)
        u = w_mat @ v
        u = u / (jnp.linalg.norm(u) + eps)
    sigma = jnp.dot(u, w_mat @ v)
    return w_oihw / sigma


def init_params(key, in_ch=3, in_planes=64):
    """Returns list of dicts with both the Pallas-ready and reference weights."""
    io = [(in_ch, in_planes),
          (in_planes, in_planes * 2),
          (in_planes * 2, in_planes * 4),
          (in_planes * 4, in_planes * 8),
          (in_planes * 8, 1)]
    params = []
    for i, (cin, cout) in enumerate(io):
        key, kw_, ku_, kb_ = jax.random.split(key, 4)
        std = (2.0 / (cin * 16)) ** 0.5
        w = jax.random.normal(kw_, (cout, cin, 4, 4), dtype=jnp.float32) * std
        if i < 4:
            w = spectral_normalize(w, ku_)        # spectral_norm-wrapped, bias=False
            b = jnp.zeros((cout,), dtype=jnp.float32)
        else:
            bound = 1.0 / (cin * 16) ** 0.5       # torch default bias init range
            b = jax.random.uniform(kb_, (cout,), jnp.float32, -bound, bound)
        w_hwio = jnp.transpose(w, (2, 3, 1, 0))   # OIHW -> HWIO (4,4,Cin,Cout), f32

        cout_pad = _round_up(cout, 128)           # lane-dense output channels
        w_kc = w_hwio.reshape(16 * cin, cout)     # (kh,kw,cin) flattened contraction
        w_kc = jnp.pad(w_kc, ((0, 0), (0, cout_pad - cout))).astype(jnp.bfloat16)
        b_pad = jnp.pad(b, (0, cout_pad - cout)).reshape(1, cout_pad)  # f32

        params.append(dict(w_hwio=w_hwio, bias=b, w_kc=w_kc, b_pad=b_pad, cout=cout))
    return params


# ----------------------------------------------------------------------------
# Forward passes
# ----------------------------------------------------------------------------
_STRIDES = (2, 2, 2, 1, 1)
_LRELUS = (True, True, True, True, False)


def discriminator_forward(x_nchw, params, alpha=0.2):
    x = jnp.transpose(x_nchw, (0, 2, 3, 1)).astype(jnp.bfloat16)   # NCHW -> NHWC, bf16
    n_layers = len(params)
    for i, (p, s, lr) in enumerate(zip(params, _STRIDES, _LRELUS)):
        last = i == n_layers - 1
        x = conv4x4_pallas(x, p["w_kc"], p["b_pad"], p["cout"],
                           stride=s, lrelu=lr, alpha=alpha,
                           out_dtype=jnp.float32 if last else jnp.bfloat16)
    return jnp.transpose(x, (0, 3, 1, 2))                          # NHWC -> NCHW


def reference_forward(x_nchw, params, alpha=0.2):
    """XLA reference with identical bf16-in / f32-accumulate precision."""
    x = jnp.transpose(x_nchw, (0, 2, 3, 1)).astype(jnp.bfloat16)
    n_layers = len(params)
    for i, (p, s, lr) in enumerate(zip(params, _STRIDES, _LRELUS)):
        w = p["w_hwio"].astype(jnp.bfloat16)
        y = jax.lax.conv_general_dilated(
            x, w, window_strides=(s, s), padding=((1, 1), (1, 1)),
            dimension_numbers=("NHWC", "HWIO", "NHWC"),
            preferred_element_type=jnp.float32)
        y = y + p["bias"]
        if lr:
            y = jnp.where(y >= 0, y, alpha * y)
        last = i == n_layers - 1
        x = y.astype(jnp.float32 if last else jnp.bfloat16)
    return jnp.transpose(x, (0, 3, 1, 2))


if __name__ == "__main__":
    key = jax.random.PRNGKey(0)
    kx, kp = jax.random.split(key)
    # batch=2, in_ch=3, spatial=32 (smallest "nice" size that keeps the last
    # two stride-1 convs' outputs non-empty: 32 -> 16 -> 8 -> 4 -> 3 -> 2).
    x = jax.random.normal(kx, (2, 3, 32, 32), dtype=jnp.float32)
    params = init_params(kp)

    out = jax.block_until_ready(discriminator_forward(x, params))
    assert out.shape == (2, 1, 2, 2), out.shape

    ref = jax.block_until_ready(reference_forward(x, params))
    np.testing.assert_allclose(np.asarray(out), np.asarray(ref),
                               rtol=2e-2, atol=2e-2)
    print("KERNEL_OK")
</pallas_src>

<mosaic_0001>
module attributes {stable_mosaic.version = 11 : i64} {
  func.func @_matmul_bias_act_kernel(%arg0: i32, %arg1: memref<256x48xbf16, #tpu.memory_space<vmem>>, %arg2: memref<48x128xbf16, #tpu.memory_space<vmem>>, %arg3: memref<1x128xf32, #tpu.memory_space<vmem>>, %arg4: memref<256x128xbf16, #tpu.memory_space<vmem>>) attributes {dimension_semantics = [#tpu.dimension_semantics<parallel>], iteration_bounds = array<i64: 2>, scalar_prefetch = 0 : i64, scratch_operands = 0 : i64, tpu.core_type = #tpu.core_type<tc>, window_params = [{transform_indices = @transform_0, window_bounds = array<i64: 256, 48>}, {pipeline_mode = #tpu.pipeline_mode<synchronous>, transform_indices = @transform_1, window_bounds = array<i64: 48, 128>}, {pipeline_mode = #tpu.pipeline_mode<synchronous>, transform_indices = @transform_2, window_bounds = array<i64: 1, 128>}, {transform_indices = @transform_3, window_bounds = array<i64: 256, 128>}]} {
    %c0 = arith.constant 0 : index
    %c0_0 = arith.constant 0 : index
    %0 = vector.load %arg1[%c0, %c0_0] : memref<256x48xbf16, #tpu.memory_space<vmem>>, vector<256x48xbf16>
    %c0_1 = arith.constant 0 : index
    %c0_2 = arith.constant 0 : index
    %1 = vector.load %arg2[%c0_1, %c0_2] : memref<48x128xbf16, #tpu.memory_space<vmem>>, vector<48x128xbf16>
    %cst = arith.constant dense<0.000000e+00> : vector<256x128xf32>
    %2 = tpu.matmul %0, %1, %cst {dimension_numbers = #tpu.dot_dimension_numbers<[1], [0], [0], [1], [0, 0, 1, 1], [], []>} : vector<256x48xbf16>, vector<48x128xbf16>, vector<256x128xf32> -> vector<256x128xf32>
    %c0_3 = arith.constant 0 : index
    %c0_4 = arith.constant 0 : index
    %3 = vector.load %arg3[%c0_3, %c0_4] : memref<1x128xf32, #tpu.memory_space<vmem>>, vector<1x128xf32>
    %4 = vector.broadcast %3 : vector<1x128xf32> to vector<256x128xf32>
    %5 = arith.addf %2, %4 : vector<256x128xf32>
    %cst_5 = arith.constant 0.000000e+00 : f32
    %6 = vector.broadcast %cst_5 : f32 to vector<256x128xf32>
    %7 = arith.cmpf oge, %5, %6 : vector<256x128xf32>
    %cst_6 = arith.constant 2.000000e-01 : f32
    %8 = vector.broadcast %cst_6 : f32 to vector<256x128xf32>
    %9 = arith.mulf %8, %5 : vector<256x128xf32>
    %10 = arith.select %7, %5, %9 : vector<256x128xi1>, vector<256x128xf32>
    %11 = arith.truncf %10 : vector<256x128xf32> to vector<256x128xbf16>
    %c0_7 = arith.constant 0 : index
    %c0_8 = arith.constant 0 : index
    %12 = vector.load %arg4[%c0_7, %c0_8] : memref<256x128xbf16, #tpu.memory_space<vmem>>, vector<256x128xbf16>
    tpu.vector_store %arg4[%c0_7, %c0_8], %11 {strides = array<i32>} : memref<256x128xbf16, #tpu.memory_space<vmem>>, vector<256x128xbf16>,
    return
  }
  func.func @transform_0(%arg0: i32) -> (i32, i32) {
    %c0_i32 = arith.constant 0 : i32
    %c0_i32_0 = arith.constant 0 : i32
    return %arg0, %c0_i32 : i32, i32
  }
  func.func @transform_1(%arg0: i32) -> (i32, i32) {
    %c0_i32 = arith.constant 0 : i32
    %c0_i32_0 = arith.constant 0 : i32
    %c0_i32_1 = arith.constant 0 : i32
    return %c0_i32, %c0_i32_0 : i32, i32
  }
  func.func @transform_2(%arg0: i32) -> (i32, i32) {
    %c0_i32 = arith.constant 0 : i32
    %c0_i32_0 = arith.constant 0 : i32
    %c0_i32_1 = arith.constant 0 : i32
    return %c0_i32, %c0_i32_0 : i32, i32
  }
  func.func @transform_3(%arg0: i32) -> (i32, i32) {
    %c0_i32 = arith.constant 0 : i32
    %c0_i32_0 = arith.constant 0 : i32
    return %arg0, %c0_i32 : i32, i32
  }
}

</mosaic_0001>

<bundles_post_ra>
// kernel: tpu_custom_call.1
= control target key start
LH: loop header
LB: loop body
LE: loop exit
PB: predicated region body
PF: predicated region fallthrough
CT: control target
= control target key end

     0   :  { %8 = vsyncpa [#allocation3], 0  ;;  %s1487_s0 = inlined_call_operand.vmem [shape: bf16[512,48], index: 0, kind: input, shape index: {}]   ;;  %s1488_s1 = inlined_call_operand.vmem [shape: bf16[48,128], index: 1, kind: input, shape index: {}]   ;;  %s1489_s2 = inlined_call_operand.vmem [shape: f32[1,128], index: 2, kind: input, shape index: {}]   ;;  %s1490_s3 = inlined_call_operand.hbm [shape: bf16[512,128], index: 3, kind: output, shape index: {}]  }
   0x1   :  { %10 = vsyncpa [#allocation3 + $0x1], 0  ;;  %s1276_s12 = smov 0   ;;  %s1278_s13 = smov 0  }
   0x2   :  { %s1280_s14 = smov 0   ;;  %s1282_s15 = smov 0  }
   0x3 LB: > { %s1297_s16 = sadd.s32 4294967295, %s1251_s15   ;;  %s858_s17 = sadd.s32 4294967294, %s1251_s15   ;;  %s1251_s15 = sphi %s1282_s15, %s1496_s15   ;;  %s1247_s14 = sphi %s1280_s14, %s1495_s14   ;;  %s1243_s13 = sphi %s1278_s13, %s1494_s13   ;;  %s1239_s12 = sphi %s1276_s12, %s1493_s12  }
   0x4   : > { %s1301_s18 = sadd.s32 1, %s1251_s15   ;;  %s91_s19 = sadd.s32 1, %s1247_s14 }
   0x5   : > { %s88_s20 = ssub.s32 %s1251_s15, %s1301_s18  ;;  %p101_p0 = scmp.ne.s32.totalorder %s1247_s14, %s1243_s13 }
   0x6   : > { %p89_p1 = scmp.eq.s32.totalorder %s88_s20, 0  ;;  %p102_p2 = scmp.eq.s32.totalorder %s1297_s16, 1 }
   0x7   : > { %p107_p3 = scmp.ne.s32.totalorder %s1243_s13, %s1239_s12  ;;  %p108_p4 = scmp.eq.s32.totalorder %s858_s17, 1 }
   0x8   : > { %s1312_s21 = scalar_select %p89_p1, %s1247_s14, %s91_s19  }
   0x9   : > { %p1314_p5 = por %p102_p2, %p101_p0  ;;  %p1318_p6 = por %p108_p4, %p107_p3 }
   0xa   : > { %p861_p7 = scmp.ge.s32.totalorder %s1251_s15, 1  ;;  %p141_p8 = scmp.lt.s32.totalorder %s1251_s15, 3 }
   0xc   : > { %p142_p9 = pnand %p861_p7, %p141_p8 }
   0xd   : > { %v1170_v0 = vld [vmem:[%s1488_s1] sm:$0xff] (!%p142_p9)   ;;  %s863_s26 = sshll.u32 (!%p142_p9), %s1297_s16, 5  ;;  %v1171_v1 = vld [vmem:[%s1488_s1 + $0x8] sm:$0xff] (!%p142_p9)   ;;  %v1172_v2 = vld [vmem:[%s1488_s1 + $0x10] sm:$0xff] (!%p142_p9)   ;;  %vm316_vm0 = vcmask (!%p142_p9), 392192   ;;  %s162_s10 = sand.u32 (!%p142_p9), 1, %s1243_s13  }
   0xe   : > { %145 = sbr.rel (%p142_p9) target bundleno = 295 (0x127), region = 32  ;;  %p166_p10 = scmp.lt.s32.totalorder (!%p142_p9), %s863_s26, 63  ;;  %1085 = vmatprep.subr.bf16.mxu0 (!%p142_p9), %v1170_v0  ;;  %1123 = vmatprep.subr.bf16.mxu1 (!%p142_p9), %v1170_v0  ;;  %v1374_v19 = vld [vmem:[%s1489_s2] ss:$0 sm:$0xff] (!%p142_p9) }
   0xf   : > { %1086 = vmatpush3.bf16.msra.mxu0 (!%p142_p9), %v1170_v0  ;;  %1126 = vmatpush3.bf16.msra.mxu1 (!%p142_p9), %v1170_v0  ;;  %s862_s11 = sshll.u32 (!%p142_p9), %s162_s10, 7  ;;  %s970_s19 = sshll.u32 (!%p142_p9), %s1297_s16, 11 }
  0x10   : > { %1087 = vmatprep.subr.bf16.mxu0 (!%p142_p9), %v1171_v1  ;;  %1124 = vmatprep.subr.bf16.mxu1 (!%p142_p9), %v1171_v1  ;;  %s1391_s17 = scalar_lea.vmem (!%p142_p9), [#allocation2], %s862_s11  ;;  %s1446_s16 = scalar_lea.sflag (!%p142_p9), [#allocation3], %s162_s10 }
  0x11   : > { %s796_s20 = sshll.u32 (!%p142_p9), %s1391_s17, 4  ;;  %s1253_s28 = smov (!%p142_p9), [#allocation2]   ;;  %s1441_s20 = int_to_ptr.vmem [resolvable:$true] %s796_s20 }
  0x12   : > { %s1189_s27 = scalar_lea.vmem (!%p142_p9), %s1441_s20, 2048  ;;  %s1193_s29 = sshll.u32 (!%p142_p9), %s1253_s28, 4  ;;  %s1194_s29 = int_to_ptr.vmem [resolvable:$false] %s1193_s29 }
  0x13   : > { %1088 = vmatpush3.bf16.msra.mxu0 (!%p142_p9), %v1171_v1  ;;  %1127 = vmatpush3.bf16.msra.mxu1 (!%p142_p9), %v1171_v1  ;;  %p1190_p11 = scmp.ne.s32.totalorder (!%p142_p9), %s1441_s20, %s1189_s27  ;;  %s1195_s30 = scalar_lea.vmem (!%p142_p9), %s1194_s29, 4096 }
  0x14   : > { %1089 = vmatprep.subr.bf16.mxu0 (!%p142_p9), %v1172_v2  ;;  %1125 = vmatprep.subr.bf16.mxu1 (!%p142_p9), %v1172_v2  ;;  %p1196_p0 = scmp.lt.s32.totalorder (!%p142_p9), %s1441_s20, %s1194_s29  ;;  %p1197_p1 = scmp.lt.s32.totalorder (!%p142_p9), %s1195_s30, %s1189_s27 }
  0x15   : > { %s1498_s26 = smov (!%p166_p10, %s863_s26), 63  ;;  %p1191_p12 = pnand %p1190_p11, %p1314_p5 }
  0x16   : > { %s864_s4 = sshll.u32 %s1498_s26, 2  ;;  %s1439_s26 = scalar_lea.hbm %s1490_s3, %s970_s19 }
  0x17   : > { %s1337_s7 = scalar_lea.vmem %s1487_s0, %s864_s4  ;;  %1090 = vmatpush3.bf16.msra.mxu0 %v1172_v2  ;;  %1128 = vmatpush3.bf16.msra.mxu1 %v1172_v2  ;;  %p1192_p13 = pneg %p1191_p12 }
  0x18   : > { %v1173_v3 = vld [vmem:[%s1337_s7] sm:$0xff]   ;;  %v1175_v5 = vld [vmem:[%s1337_s7 + $0x8] sm:$0xff]   ;;  %v1177_v7 = vld [vmem:[%s1337_s7 + $0x10] sm:$0xff]   ;;  %p1198_p2 = por %p1197_p1, %p1196_p0 }
  0x19   : > { %v1174_v4 = vld [vmem:[%s1337_s7 + $0x40] sm:$0xff]   ;;  %1091 = vmatprep.mubr.msk.bf16.mxu0 %vm316_vm0, %v1173_v3  ;;  %v1176_v6 = vld [vmem:[%s1337_s7 + $0x48] sm:$0xff]   ;;  %v1178_v8 = vld [vmem:[%s1337_s7 + $0x50] sm:$0xff]  }
  0x1a   : > { %1107 = vmatprep.mubr.msk.bf16.mxu1 %vm316_vm0, %v1174_v4  ;;  %1092 = vmatmul.mubr.msk.bf16.vlgmr.msra.gmra.mrb[0].mxu0 %vm316_vm0, %v1175_v5  ;;  %v1179_v9 = vld [vmem:[%s1337_s7 + $0x18] sm:$0xff]   ;;  %v1181_v11 = vld [vmem:[%s1337_s7 + $0x20] sm:$0xff]   ;;  %v1183_v13 = vld [vmem:[%s1337_s7 + $0x28] sm:$0xff]   ;;  %p1199_p3 = pnand %p1198_p2, %p1192_p13 }
  0x1b   : > { %1108 = vmatmul.mubr.msk.bf16.vlgmr.msra.gmra.mrb[0].mxu1 %vm316_vm0, %v1176_v6  ;;  %1095 = vmatprep.mubr.msk.bf16.mxu0 %vm316_vm0, %v1177_v7  ;;  %v1180_v10 = vld [vmem:[%s1337_s7 + $0x58] sm:$0xff]   ;;  %v1182_v12 = vld [vmem:[%s1337_s7 + $0x60] sm:$0xff]   ;;  %v1184_v14 = vld [vmem:[%s1337_s7 + $0x68] sm:$0xff]  }
  0x1c   : > { %1111 = vmatprep.mubr.msk.bf16.mxu1 %vm316_vm0, %v1178_v8  ;;  %v1185_v15 = vld [vmem:[%s1337_s7 + $0x30] sm:$0xff]   ;;  %v1187_v17 = vld [vmem:[%s1337_s7 + $0x38] sm:$0xff]  }
  0x1d   : > { %v1186_v16 = vld [vmem:[%s1337_s7 + $0x70] sm:$0xff]   ;;  %v1188_v18 = vld [vmem:[%s1337_s7 + $0x78] sm:$0xff]  }
  0x22   : > { %1096 = vmatmul.mubr.msk.bf16.gmra.mrb[4].mxu0 %vm316_vm0, %v1179_v9 }
  0x23   : > { %1112 = vmatmul.mubr.msk.bf16.gmra.mrb[4].mxu1 %vm316_vm0, %v1180_v10  ;;  %1099 = vmatprep.mubr.msk.bf16.mxu0 %vm316_vm0, %v1181_v11 }
  0x24   : > { %1115 = vmatprep.mubr.msk.bf16.mxu1 %vm316_vm0, %v1182_v12 }
  0x2a   : > { %1100 = vmatmul.mubr.msk.bf16.gmra.mrb[8].mxu0 %vm316_vm0, %v1183_v13 }
  0x2b   : > { %1116 = vmatmul.mubr.msk.bf16.gmra.mrb[8].mxu1 %vm316_vm0, %v1184_v14  ;;  %1103 = vmatprep.mubr.msk.bf16.mxu0 %vm316_vm0, %v1185_v15 }
  0x2c   : > { %1119 = vmatprep.mubr.msk.bf16.mxu1 %vm316_vm0, %v1186_v16 }
  0x32   : > { %1104 = vmatmul.mubr.msk.bf16.gmra.mrb[12].mxu0 %vm316_vm0, %v1187_v17 }
  0x33   : > { %1120 = vmatmul.mubr.msk.bf16.gmra.mrb[12].mxu1 %vm316_vm0, %v1188_v18 }
  0xed   : > { %v1093_v20 = vpop.f32.mrb[0].mxu0 }
  0xee   : > { %v1109_v21 = vpop.f32.mrb[0].mxu1  ;;  %v408_v22 = vadd.f32 %v1093_v20, %v1374_v19  ;;  %v399_v24 = vpop.f32.mrb[1].mxu0 }
  0xef   : > { %v472_v23 = vadd.f32 %v1109_v21, %v1374_v19  ;;  %v463_v25 = vpop.f32.mrb[1].mxu1  ;;  %v400_v26 = vadd.f32 %v1374_v19, %v399_v24  ;;  %v1094_v28 = vpop.f32.mrb[2].mxu0 }
  0xf0   : > { %v464_v27 = vadd.f32 %v1374_v19, %v463_v25  ;;  %v1110_v29 = vpop.f32.mrb[2].mxu1  ;;  %vm528_vm1 = vcmp.ge.f32.partialorder %v408_v22, 0.0  ;;  %v560_v30 = vmul.f32 0.2, %v408_v22  ;;  %v411_v34 = vadd.f32 %v1094_v28, %v1374_v19  ;;  %v402_v36 = vpop.f32.mrb[3].mxu0 }
  0xf1   : > { %vm544_vm2 = vcmp.ge.f32.partialorder %v472_v23, 0.0  ;;  %v576_v31 = vmul.f32 0.2, %v472_v23  ;;  %vm526_vm3 = vcmp.ge.f32.partialorder %v400_v26, 0.0  ;;  %v558_v32 = vmul.f32 0.2, %v400_v26 }
  0xf2   : > { %vm542_vm4 = vcmp.ge.f32.partialorder %v464_v27, 0.0  ;;  %v574_v33 = vmul.f32 0.2, %v464_v27  ;;  %v475_v35 = vadd.f32 %v1110_v29, %v1374_v19  ;;  %v466_v37 = vpop.f32.mrb[3].mxu1  ;;  %v592_v38 = vsel %vm528_vm1, %v408_v22, %v560_v30 }
  0xf3   : > { %v608_v39 = vsel %vm544_vm2, %v472_v23, %v576_v31  ;;  %v403_v40 = vadd.f32 %v1374_v19, %v402_v36  ;;  %v467_v41 = vadd.f32 %v1374_v19, %v466_v37  ;;  %vm529_vm5 = vcmp.ge.f32.partialorder %v411_v34, 0.0 }
  0xf4   : > { %v561_v42 = vmul.f32 0.2, %v411_v34  ;;  %vm545_vm6 = vcmp.ge.f32.partialorder %v475_v35, 0.0  ;;  %v577_v43 = vmul.f32 0.2, %v475_v35  ;;  %v590_v46 = vsel %vm526_vm3, %v400_v26, %v558_v32 }
  0xf5   : > { %vm527_vm7 = vcmp.ge.f32.partialorder %v403_v40, 0.0  ;;  %v559_v44 = vmul.f32 0.2, %v403_v40  ;;  %vm543_vm8 = vcmp.ge.f32.partialorder %v467_v41, 0.0  ;;  %v575_v45 = vmul.f32 0.2, %v467_v41 }
  0xf6   : > { %v606_v47 = vsel %vm542_vm4, %v464_v27, %v574_v33  ;;  %v593_v48 = vsel %vm529_vm5, %v411_v34, %v561_v42  ;;  %v609_v49 = vsel %vm545_vm6, %v475_v35, %v577_v43  ;;  %v1097_v50 = vpop.f32.mrb[4].mxu0  ;;  %v1113_v51 = vpop.f32.mrb[4].mxu1 }
  0xf7   : > { %v979_v52 = vpack.c.bf16 %v593_v48, %v592_v38  ;;  %v1019_v53 = vpack.c.bf16 %v609_v49, %v608_v39  ;;  %v591_v54 = vsel %vm527_vm7, %v403_v40, %v559_v44  ;;  %v607_v55 = vsel %vm543_vm8, %v467_v41, %v575_v45  ;;  %v415_v56 = vpop.f32.mrb[5].mxu0  ;;  %v479_v57 = vpop.f32.mrb[5].mxu1 }
  0xf8   : > { %v974_v58 = vpack.c.bf16 %v591_v54, %v590_v46  ;;  %v1014_v59 = vpack.c.bf16 %v607_v55, %v606_v47  ;;  %v424_v60 = vadd.f32 %v1097_v50, %v1374_v19  ;;  %v488_v61 = vadd.f32 %v1113_v51, %v1374_v19  ;;  %v1098_v62 = vpop.f32.mrb[6].mxu0  ;;  %v1114_v63 = vpop.f32.mrb[6].mxu1 }
  0xf9   : > { %1051 = vst [vmem:[%s1391_s17 + $0x8] sm:$0xff] %v979_v52   ;;  %1059 = vst [vmem:[%s1391_s17 + $0x48] sm:$0xff] %v1019_v53   ;;  %v416_v0 = vadd.f32 %v1374_v19, %v415_v56  ;;  %v480_v1 = vadd.f32 %v1374_v19, %v479_v57  ;;  %v427_v2 = vadd.f32 %v1098_v62, %v1374_v19  ;;  %v418_v4 = vpop.f32.mrb[7].mxu0  ;;  %v482_v5 = vpop.f32.mrb[7].mxu1 }
  0xfa   : > { %v491_v3 = vadd.f32 %v1114_v63, %v1374_v19  ;;  %975 = vst [vmem:[%s1391_s17] sm:$0xff] %v974_v58   ;;  %1058 = vst [vmem:[%s1391_s17 + $0x40] sm:$0xff] %v1014_v59   ;;  %vm532_vm9 = vcmp.ge.f32.partialorder %v424_v60, 0.0  ;;  %v564_v6 = vmul.f32 0.2, %v424_v60  ;;  %vm548_vm10 = vcmp.ge.f32.partialorder %v488_v61, 0.0 }
  0xfb   : > { %v580_v7 = vmul.f32 0.2, %v488_v61  ;;  %vm530_vm11 = vcmp.ge.f32.partialorder %v416_v0, 0.0  ;;  %v562_v8 = vmul.f32 0.2, %v416_v0  ;;  %vm546_vm12 = vcmp.ge.f32.partialorder %v480_v1, 0.0 }
  0xfc   : > { %v596_v9 = vsel %vm532_vm9, %v424_v60, %v564_v6  ;;  %v578_v10 = vmul.f32 0.2, %v480_v1  ;;  %vm533_vm13 = vcmp.ge.f32.partialorder %v427_v2, 0.0  ;;  %v565_v11 = vmul.f32 0.2, %v427_v2 }
  0xfd   : > { %v612_v12 = vsel %vm548_vm10, %v488_v61, %v580_v7  ;;  %v594_v13 = vsel %vm530_vm11, %v416_v0, %v562_v8  ;;  %vm549_vm14 = vcmp.ge.f32.partialorder %v491_v3, 0.0  ;;  %v581_v14 = vmul.f32 0.2, %v491_v3  ;;  %v1101_v15 = vpop.f32.mrb[8].mxu0 }
  0xfe   : > { %v1117_v16 = vpop.f32.mrb[8].mxu1  ;;  %v597_v17 = vsel %vm533_vm13, %v427_v2, %v565_v11  ;;  %v419_v18 = vadd.f32 %v1374_v19, %v418_v4  ;;  %v483_v20 = vadd.f32 %v1374_v19, %v482_v5  ;;  %v440_v21 = vadd.f32 %v1101_v15, %v1374_v19  ;;  %v431_v22 = vpop.f32.mrb[9].mxu0 }
  0xff   : > { %v495_v23 = vpop.f32.mrb[9].mxu1  ;;  %v989_v24 = vpack.c.bf16 %v597_v17, %v596_v9  ;;  %v613_v25 = vsel %vm549_vm14, %v491_v3, %v581_v14  ;;  %v504_v26 = vadd.f32 %v1117_v16, %v1374_v19  ;;  %v432_v27 = vadd.f32 %v1374_v19, %v431_v22  ;;  %v1102_v28 = vpop.f32.mrb[10].mxu0 }
 0x100   : > { %v1118_v29 = vpop.f32.mrb[10].mxu1  ;;  %v1029_v30 = vpack.c.bf16 %v613_v25, %v612_v12  ;;  %vm531_vm15 = vcmp.ge.f32.partialorder %v419_v18, 0.0  ;;  %v563_v31 = vmul.f32 0.2, %v419_v18  ;;  %vm547_vm0 = vcmp.ge.f32.partialorder %v483_v20, 0.0  ;;  %v434_v32 = vpop.f32.mrb[11].mxu0 }
 0x101   : > { %v498_v33 = vpop.f32.mrb[11].mxu1  ;;  %1053 = vst [vmem:[%s1391_s17 + $0x18] sm:$0xff] %v989_v24   ;;  %v579_v34 = vmul.f32 0.2, %v483_v20  ;;  %vm536_vm1 = vcmp.ge.f32.partialorder %v440_v21, 0.0  ;;  %vm552_vm2 = vcmp.ge.f32.partialorder %v504_v26, 0.0  ;;  %v610_v36 = vsel %vm546_vm12, %v480_v1, %v578_v10 }
 0x102   : > { %v568_v35 = vmul.f32 0.2, %v440_v21  ;;  %1061 = vst [vmem:[%s1391_s17 + $0x58] sm:$0xff] %v1029_v30   ;;  %v595_v37 = vsel %vm531_vm15, %v419_v18, %v563_v31  ;;  %v584_v38 = vmul.f32 0.2, %v504_v26  ;;  %vm534_vm3 = vcmp.ge.f32.partialorder %v432_v27, 0.0 }
 0x103   : > { %v984_v39 = vpack.c.bf16 %v595_v37, %v594_v13  ;;  %v611_v40 = vsel %vm547_vm0, %v483_v20, %v579_v34  ;;  %v566_v41 = vmul.f32 0.2, %v432_v27  ;;  %v496_v42 = vadd.f32 %v1374_v19, %v495_v23 }
 0x104   : > { %v1024_v43 = vpack.c.bf16 %v611_v40, %v610_v36  ;;  %v600_v44 = vsel %vm536_vm1, %v440_v21, %v568_v35  ;;  %v616_v45 = vsel %vm552_vm2, %v504_v26, %v584_v38  ;;  %v443_v46 = vadd.f32 %v1102_v28, %v1374_v19 }
 0x105   : > { %1052 = vst [vmem:[%s1391_s17 + $0x10] sm:$0xff] %v984_v39   ;;  %vm550_vm4 = vcmp.ge.f32.partialorder %v496_v42, 0.0  ;;  %v582_v47 = vmul.f32 0.2, %v496_v42  ;;  %v507_v48 = vadd.f32 %v1118_v29, %v1374_v19  ;;  %v435_v49 = vadd.f32 %v1374_v19, %v434_v32  ;;  %v1105_v50 = vpop.f32.mrb[12].mxu0 }
 0x106   : > { %v1121_v51 = vpop.f32.mrb[12].mxu1  ;;  %1060 = vst [vmem:[%s1391_s17 + $0x50] sm:$0xff] %v1024_v43   ;;  %vm537_vm5 = vcmp.ge.f32.partialorder %v443_v46, 0.0  ;;  %v569_v52 = vmul.f32 0.2, %v443_v46  ;;  %v499_v53 = vadd.f32 %v1374_v19, %v498_v33  ;;  %v456_v54 = vadd.f32 %v1105_v50, %v1374_v19  ;;  %v447_v55 = vpop.f32.mrb[13].mxu0 }
 0x107   : > { %v511_v56 = vpop.f32.mrb[13].mxu1  ;;  %v598_v57 = vsel %vm534_vm3, %v432_v27, %v566_v41  ;;  %vm553_vm6 = vcmp.ge.f32.partialorder %v507_v48, 0.0  ;;  %v585_v58 = vmul.f32 0.2, %v507_v48  ;;  %vm535_vm7 = vcmp.ge.f32.partialorder %v435_v49, 0.0  ;;  %v1106_v59 = vpop.f32.mrb[14].mxu0 }
 0x108   : > { %v1122_v60 = vpop.f32.mrb[14].mxu1  ;;  %v601_v61 = vsel %vm537_vm5, %v443_v46, %v569_v52  ;;  %v567_v62 = vmul.f32 0.2, %v435_v49  ;;  %vm551_vm8 = vcmp.ge.f32.partialorder %v499_v53, 0.0  ;;  %v583_v63 = vmul.f32 0.2, %v499_v53 }
 0x109   : > { %v450_v0 = vpop.f32.mrb[15].mxu0  ;;  %v614_v1 = vsel %vm550_vm4, %v496_v42, %v582_v47  ;;  %v999_v2 = vpack.c.bf16 %v601_v61, %v600_v44  ;;  %v617_v3 = vsel %vm553_vm6, %v507_v48, %v585_v58  ;;  %v572_v4 = vmul.f32 0.2, %v456_v54  ;;  %v514_v5 = vpop.f32.mrb[15].mxu1 }
 0x10a   : > { %v1039_v6 = vpack.c.bf16 %v617_v3, %v616_v45  ;;  %v599_v7 = vsel %vm535_vm7, %v435_v49, %v567_v62  ;;  %v615_v8 = vsel %vm551_vm8, %v499_v53, %v583_v63  ;;  %v520_v9 = vadd.f32 %v1121_v51, %v1374_v19 }
 0x10b   : > { %1055 = vst [vmem:[%s1391_s17 + $0x28] sm:$0xff] %v999_v2   ;;  %v994_v10 = vpack.c.bf16 %v599_v7, %v598_v57  ;;  %v1034_v11 = vpack.c.bf16 %v615_v8, %v614_v1  ;;  %vm540_vm9 = vcmp.ge.f32.partialorder %v456_v54, 0.0  ;;  %v448_v12 = vadd.f32 %v1374_v19, %v447_v55 }
 0x10c   : > { %1063 = vst [vmem:[%s1391_s17 + $0x68] sm:$0xff] %v1039_v6   ;;  %vm556_vm10 = vcmp.ge.f32.partialorder %v520_v9, 0.0  ;;  %v588_v13 = vmul.f32 0.2, %v520_v9  ;;  %v512_v14 = vadd.f32 %v1374_v19, %v511_v56  ;;  %v459_v15 = vadd.f32 %v1106_v59, %v1374_v19 }
 0x10d   : > { %1054 = vst [vmem:[%s1391_s17 + $0x20] sm:$0xff] %v994_v10   ;;  %1062 = vst [vmem:[%s1391_s17 + $0x60] sm:$0xff] %v1034_v11   ;;  %v570_v16 = vmul.f32 0.2, %v448_v12  ;;  %v523_v17 = vadd.f32 %v1122_v60, %v1374_v19  ;;  %v451_v18 = vadd.f32 %v1374_v19, %v450_v0  ;;  %v604_v20 = vsel %vm540_vm9, %v456_v54, %v572_v4 }
 0x10e   : > { %vm538_vm11 = vcmp.ge.f32.partialorder %v448_v12, 0.0  ;;  %vm541_vm12 = vcmp.ge.f32.partialorder %v459_v15, 0.0  ;;  %v620_v21 = vsel %vm556_vm10, %v520_v9, %v588_v13  ;;  %v573_v22 = vmul.f32 0.2, %v459_v15 }
 0x10f   : > { %vm557_vm13 = vcmp.ge.f32.partialorder %v523_v17, 0.0  ;;  %v589_v23 = vmul.f32 0.2, %v523_v17  ;;  %vm554_vm14 = vcmp.ge.f32.partialorder %v512_v14, 0.0  ;;  %vm539_vm15 = vcmp.ge.f32.partialorder %v451_v18, 0.0 }
 0x110   : > { %v571_v24 = vmul.f32 0.2, %v451_v18  ;;  %v515_v25 = vadd.f32 %v1374_v19, %v514_v5  ;;  %v602_v26 = vsel %vm538_vm11, %v448_v12, %v570_v16  ;;  %v586_v27 = vmul.f32 0.2, %v512_v14 }
 0x111   : > { %v605_v28 = vsel %vm541_vm12, %v459_v15, %v573_v22  ;;  %v621_v29 = vsel %vm557_vm13, %v523_v17, %v589_v23 }
 0x112   : > { %v1009_v30 = vpack.c.bf16 %v605_v28, %v604_v20  ;;  %v1049_v31 = vpack.c.bf16 %v621_v29, %v620_v21  ;;  %v603_v32 = vsel %vm539_vm15, %v451_v18, %v571_v24  ;;  %vm555_vm0 = vcmp.ge.f32.partialorder %v515_v25, 0.0 }
 0x113   : > { %v1004_v33 = vpack.c.bf16 %v603_v32, %v602_v26  ;;  %v587_v34 = vmul.f32 0.2, %v515_v25  ;;  %v618_v19 = vsel %vm554_vm14, %v512_v14, %v586_v27 }
 0x114   : > { %1057 = vst [vmem:[%s1391_s17 + $0x38] sm:$0xff] %v1009_v30   ;;  %1065 = vst [vmem:[%s1391_s17 + $0x78] sm:$0xff] %v1049_v31  }
 0x115   : > { %1056 = vst [vmem:[%s1391_s17 + $0x30] sm:$0xff] %v1004_v33   ;;  %v619_v35 = vsel %vm555_vm0, %v515_v25, %v587_v34 }
 0x116   : > { %v1044_v36 = vpack.c.bf16 %v619_v35, %v618_v19 }
 0x118   : > { %1064 = vst [vmem:[%s1391_s17 + $0x70] sm:$0xff] %v1044_v36  }
 0x119   : > { %1202 = shalt.err (!%p1199_p3)
}
 0x11a   : > { %s1203_s4 = scalar_lea.hbm %s1439_s26, 2048  ;;  %s1207_s7 = scalar_lea.hbm %s1490_s3, 4096 }
 0x11b   : > { %p1204_p4 = scmp.ne.s32.totalorder %s1439_s26, %s1203_s4  ;;  %p1208_p9 = scmp.lt.u32.totalorder %s1439_s26, %s1490_s3 }
 0x11c   : > { %p1209_p10 = scmp.lt.u32.totalorder %s1207_s7, %s1203_s4  ;;  %p1211_p12 = scmp.lt.u32.totalorder %s1203_s4, %s1439_s26 }
 0x11d   : > { %p1205_p7 = pnand %p1204_p4, %p1314_p5 }
 0x11e   : > { %p1210_p11 = por %p1209_p10, %p1208_p9 }
 0x11f   : > { %p1206_p8 = pneg %p1205_p7 }
 0x120   : > { %p1212_p13 = por %p1211_p12, %p1210_p11 }
 0x122   : > { %p1213_p0 = pnand %p1212_p13, %p1206_p8 }
 0x124   : > { %1216 = shalt.err (!%p1213_p0)
}
 0x125   : > { %s1254_s10 = smov 64   ;;  %s1255_s11 = smov 4  }
 0x126   : > { %1129 = dma.vmem_to_hbm [thread:$0]  (%p1314_p5), %s1441_s20, 2048, %s1439_s26, %s1446_s16, %s1254_s10, %s1254_s10, %s1255_s11  }
 0x127 PF: > { %p1135_p1 = scmp.ge.s32.totalorder %s1251_s15, 2  ;;  %s811_s17 = sand.u32 1, %s1239_s12  }
 0x128   : > { %s812_s19 = scalar_lea.sflag [#allocation3], %s811_s17 }
 0x129   : > { %p1132_p2 = pnand %p1135_p1, %p1318_p6 }
 0x12b   : > { %1234 = dma.done.wait (!%p1132_p2), %s812_s19, 2048  }
 0x12c   : > { %1236 = vsyncadd (!%p1132_p2), %s812_s19, 4294965248  ;;  %p13_p3 = scmp.ge.s32.totalorder %s1301_s18, 4   ;;  %s1493_s12 = smov %s1243_s13 }
 0x12d   : > { %s1494_s13 = smov %s1247_s14  ;;  %s1495_s14 = smov %s1312_s21 }
 0x12e   : > { %s1496_s15 = smov %s1301_s18  ;;  %15 = sbr.rel (!%p13_p3) target bundleno = 3 (0x3), region = 67 }
 0x135   :  { %817 = vsyncpa [#allocation3], 1 }
 0x136   :  { %819 = vsyncpa [#allocation3 + $0x1], 1 }

</bundles_post_ra>
